<compile_context>
chip_gen: v5e
topology: v5e:2x2
jax: 0.10.0
libtpu: 0.0.40
codegen_flags: <defaults>
</compile_context>

<pallas_src>
import math
import functools

import jax
import jax.numpy as jnp
from jax.experimental import pallas as pl
from jax.experimental.pallas import tpu as pltpu


# ------------------------- Pallas kernels -------------------------

def _heaviside_kernel(x_ref, o_ref):
    # (x >= 0) -> 1, else 0, in the output dtype.  NaN compares False -> 0,
    # matching `(x >= 0).to(x)` in the reference module.
    o_ref[...] = (x_ref[...] >= 0).astype(o_ref.dtype)


def _primitive_kernel(x_ref, o_ref, *, n: int, T_period: float):
    x = x_ref[...].astype(jnp.float32)
    w = 2.0 * math.pi / T_period
    y = jnp.full(x.shape, 0.5, dtype=jnp.float32)
    for i in range(1, n):                  # n is small and static
        k = 2.0 * i - 1.0
        coef = (2.0 / math.pi) / k         # folded constants: no per-element divide
        freq = k * w
        y = y + coef * jnp.sin(freq * x)   # sin -> EUP; mul/add -> VPU filler
    o_ref[...] = y.astype(o_ref.dtype)


# ------------------------- wrapper -------------------------

_LANE = 128
_SUBLANE_ALIGN = 32                       # dtype-proof (bf16 packs 16, int8/fp8 pack 32 sublanes)
_TARGET_BLOCK_BYTES = 2 * 1024 * 1024     # ~2 MiB per block
# Widest-first 128-multiples tried for the slab's last dim (must divide n_elem).
_COL_CANDIDATES = (8192, 6144, 4096, 3072, 2048, 1536, 1024, 768, 512, 384, 256, 128)


def _pallas_elementwise_2d(kernel_fn, x2d):
    """Run an elementwise kernel over a lane-dense (rows, cols) slab."""
    rows, cols = x2d.shape
    itemsize = jnp.dtype(x2d.dtype).itemsize

    tile_rows = max(1, _TARGET_BLOCK_BYTES // (cols * itemsize))
    if tile_rows >= rows:
        tile_rows = rows                   # single block over rows (block == full dim: legal)
    else:
        tile_rows = max(_SUBLANE_ALIGN,
                        (tile_rows // _SUBLANE_ALIGN) * _SUBLANE_ALIGN)
        if tile_rows >= rows:
            tile_rows = rows
    grid = (pl.cdiv(rows, tile_rows),)     # uneven last block is masked by Pallas

    return pl.pallas_call(
        kernel_fn,
        out_shape=jax.ShapeDtypeStruct((rows, cols), x2d.dtype),
        grid_spec=pltpu.PrefetchScalarGridSpec(
            num_scalar_prefetch=0,
            grid=grid,
            in_specs=[pl.BlockSpec((tile_rows, cols), lambda i: (i, 0))],
            out_specs=pl.BlockSpec((tile_rows, cols), lambda i: (i, 0)),
        ),
        compiler_params=pltpu.CompilerParams(
            dimension_semantics=("parallel",)),
    )(x2d)


def _run_elementwise(kernel_fn, x):
    """Present x as a wide, lane-dense 2-D slab (free reshape when possible)."""
    orig_shape = x.shape
    n = x.size
    if n == 0:
        return x

    cols = next((c for c in _COL_CANDIDATES if n % c == 0), None)
    if cols is not None:
        # Fast path: contiguous collapse is free -- no padding, no extra HBM passes.
        out2d = _pallas_elementwise_2d(kernel_fn, x.reshape(n // cols, cols))
        return out2d.reshape(orig_shape)

    # Ragged fallback (element count not a multiple of 128): pad the flat array
    # up to an aligned slab, run the kernel, slice the valid prefix back out.
    cols = 1024 if n >= (1 << 16) else _LANE
    padded = pl.cdiv(n, _SUBLANE_ALIGN * cols) * (_SUBLANE_ALIGN * cols)
    flat = jnp.concatenate([x.reshape(-1),
                            jnp.zeros((padded - n,), dtype=x.dtype)])
    out2d = _pallas_elementwise_2d(kernel_fn, flat.reshape(padded // cols, cols))
    return out2d.reshape(-1)[:n].reshape(orig_shape)


class SquarewaveFourierSeries:
    """JAX/Pallas port of the SpikingJelly SquarewaveFourierSeries surrogate (forward only)."""

    def __init__(self, n: int = 2, T_period: float = 8, spiking: bool = True):
        assert isinstance(n, int) and T_period > 0.0
        self.n = n
        self.T_period = T_period
        self.spiking = spiking
        # TODO(synk): the custom backward (cosine Fourier surrogate gradient) is not
        # implemented; only the forward pass is reproduced here.

    def set_spiking_mode(self, spiking: bool):
        self.spiking = spiking

    def __call__(self, x):
        if self.spiking:
            # NOTE: in a full model, plain `(x >= 0).astype(x.dtype)` would let XLA
            # fuse the compare+cast into neighbouring ops; the Pallas path is kept
            # here since this module is ported standalone.
            return _run_elementwise(_heaviside_kernel, x)
        kern = functools.partial(_primitive_kernel, n=self.n, T_period=self.T_period)
        return _run_elementwise(kern, x)


# ------------------------- demo / check -------------------------

if __name__ == "__main__":
    key = jax.random.PRNGKey(0)
    # NCHW input, small shapes: batch=2, channels=4, spatial=16x16
    x = jax.random.normal(key, (2, 4, 16, 16), dtype=jnp.float32)

    def ref_primitive(xx, n, T_period):
        w = 2.0 * math.pi / T_period
        ret = jnp.zeros_like(xx)
        for i in range(1, n):
            c = 2.0 * i - 1.0
            ret = ret + jnp.sin(c * w * xx) / c
        return 0.5 + (2.0 / math.pi) * ret

    # spiking=True path (heaviside)
    mod_spk = SquarewaveFourierSeries(n=2, T_period=8, spiking=True)
    y_spk = jax.block_until_ready(mod_spk(x))
    ref_spk = (x >= 0).astype(x.dtype)
    assert y_spk.shape == x.shape and y_spk.dtype == x.dtype
    assert jnp.array_equal(y_spk, ref_spk)

    # spiking=False path (squarewave Fourier series primitive)
    mod_prim = SquarewaveFourierSeries(n=2, T_period=8, spiking=False)
    y_prim = jax.block_until_ready(mod_prim(x))
    assert y_prim.shape == x.shape and y_prim.dtype == x.dtype
    assert jnp.allclose(y_prim, ref_primitive(x, 2, 8.0), atol=1e-5, rtol=1e-5)

    # odd-sized input exercises the ragged (padded) fallback and a longer series
    x_odd = jax.random.normal(jax.random.PRNGKey(0), (3, 5, 7), dtype=jnp.float32)
    mod3 = SquarewaveFourierSeries(n=3, T_period=8, spiking=False)
    y_odd = jax.block_until_ready(mod3(x_odd))
    assert y_odd.shape == x_odd.shape and y_odd.dtype == x_odd.dtype
    assert jnp.allclose(y_odd, ref_primitive(x_odd, 3, 8.0), atol=1e-5, rtol=1e-5)

    print("KERNEL_OK")
</pallas_src>

<mosaic_0001>
module attributes {stable_mosaic.version = 11 : i64} {
  func.func @_heaviside_kernel(%arg0: i32, %arg1: memref<1x2048xf32, #tpu.memory_space<vmem>>, %arg2: memref<1x2048xf32, #tpu.memory_space<vmem>>) attributes {dimension_semantics = [#tpu.dimension_semantics<parallel>], iteration_bounds = array<i64: 1>, scalar_prefetch = 0 : i64, scratch_operands = 0 : i64, tpu.core_type = #tpu.core_type<tc>, window_params = [{transform_indices = @transform_0, window_bounds = array<i64: 1, 2048>}, {transform_indices = @transform_1, window_bounds = array<i64: 1, 2048>}]} {
    %c0 = arith.constant 0 : index
    %c0_0 = arith.constant 0 : index
    %0 = vector.load %arg1[%c0, %c0_0] : memref<1x2048xf32, #tpu.memory_space<vmem>>, vector<1x2048xf32>
    %cst = arith.constant 0.000000e+00 : f32
    %1 = vector.broadcast %cst : f32 to vector<1x2048xf32>
    %2 = arith.cmpf oge, %0, %1 : vector<1x2048xf32>
    %3 = arith.extui %2 : vector<1x2048xi1> to vector<1x2048xi32>
    %4 = arith.sitofp %3 : vector<1x2048xi32> to vector<1x2048xf32>
    %c0_1 = arith.constant 0 : index
    %c0_2 = arith.constant 0 : index
    %5 = vector.load %arg2[%c0_1, %c0_2] : memref<1x2048xf32, #tpu.memory_space<vmem>>, vector<1x2048xf32>
    tpu.vector_store %arg2[%c0_1, %c0_2], %4 {strides = array<i32>} : memref<1x2048xf32, #tpu.memory_space<vmem>>, vector<1x2048xf32>,
    return
  }
  func.func @transform_0(%arg0: i32) -> (i32, i32) {
    %c0_i32 = arith.constant 0 : i32
    %c0_i32_0 = arith.constant 0 : i32
    return %arg0, %c0_i32 : i32, i32
  }
  func.func @transform_1(%arg0: i32) -> (i32, i32) {
    %c0_i32 = arith.constant 0 : i32
    %c0_i32_0 = arith.constant 0 : i32
    return %arg0, %c0_i32 : i32, i32
  }
}

</mosaic_0001>

<bundles_post_ra>
// kernel: tpu_custom_call.1
= control target key start
LH: loop header
LB: loop body
LE: loop exit
PB: predicated region body
PF: predicated region fallthrough
CT: control target
= control target key end

     0   :  { %6 = vsyncpa [#allocation3], 0  ;;  %s126_s0 = inlined_call_operand.hbm [shape: f32[1,2048], index: 0, kind: input, shape index: {}]   ;;  %s127_s1 = inlined_call_operand.hbm [shape: f32[1,2048], index: 1, kind: output, shape index: {}]  }
   0x1   :  { %7 = vsyncpa [#allocation4], 0  ;;  %s13_s8 = sshll.u32 %s126_s0, 4  ;;  %s107_s9 = smov [#allocation2]   ;;  %s14_s8 = int_to_ptr.hbm [resolvable:$true] %s13_s8 }
   0x2   :  { %s15_s10 = sshll.u32 %s107_s9, 4  ;;  %s16_s10 = int_to_ptr.vmem [resolvable:$true] %s15_s10 }
   0x3   :  { %18 = dma.hbm_to_vmem [thread:$0]  %s14_s8, 256, %s16_s10, [#allocation3]  }
   0x4   :  { %103 = dma.done.wait [#allocation3], 256  }
   0x5   :  { %104 = vsyncadd [#allocation3], 4294967040  ;;  %s108_s11 = smov [#allocation5]   ;;  %s40_s15 = sshll.u32 %s127_s1, 4  ;;  %v23_v0 = vld [vmem:[#allocation2] sm:$0xff]  ;;  %v24_v1 = vld [vmem:[#allocation2 + $0x8] sm:$0xff]  ;;  %s41_s15 = int_to_ptr.hbm [resolvable:$true] %s40_s15 }
   0x6   :  { %s38_s12 = sshll.u32 %s108_s11, 4  ;;  %vm25_vm0 = vcmp.ge.f32.partialorder %v23_v0, 0.0  ;;  %vm26_vm1 = vcmp.ge.f32.partialorder %v24_v1, 0.0  ;;  %v109_v2 = vmov 0.0   ;;  %s39_s12 = int_to_ptr.vmem [resolvable:$true] %s38_s12 }
   0x7   :  { %v50_v3 = vsel %vm25_vm0, 1.0, %v109_v2  ;;  %v51_v4 = vsel %vm26_vm1, 1.0, %v109_v2 }
   0x8   :  { %31 = vst [vmem:[#allocation5] sm:$0xff] %v50_v3 }
   0x9   :  { %32 = vst [vmem:[#allocation5 + $0x8] sm:$0xff] %v51_v4 }
   0xa   :  { %43 = dma.vmem_to_hbm [thread:$0]  %s39_s12, 256, %s41_s15, [#allocation4]  }
   0xb   :  { %105 = dma.done.wait [#allocation4], 256  }
   0xc   :  { %106 = vsyncadd [#allocation4], 4294967040 }
   0xd   :  { %48 = vsyncpa [#allocation3], 1 }
   0xe   :  { %49 = vsyncpa [#allocation4], 1 }

</bundles_post_ra>
